<compile_context>
chip_gen: v7x
topology: tpu7x:2x2x1
jax: 0.10.0
libtpu: 0.0.40
codegen_flags: <defaults>
</compile_context>

<pallas_src>
import jax
import jax.numpy as jnp
from jax import lax
from jax.experimental import pallas as pl
from jax.experimental.pallas import tpu as pltpu


def actor_kernel(obs_ref, gum_ref, w1_ref, w2_ref, w3_ref, b_ref, act_ref):
    """One batch block: 3 matmuls + ReLUs + Gumbel-max categorical sample."""
    cdt = w1_ref.dtype                      # MXU compute dtype (bf16)
    b = b_ref[...]                          # (3, width) packed f32 biases

    x = obs_ref[...]                        # (block_b, obs_p) bf16
    h = jnp.dot(x, w1_ref[...], preferred_element_type=jnp.float32)
    h = jnp.maximum(h + b[0:1, :h.shape[-1]], 0.0)

    h = jnp.dot(h.astype(cdt), w2_ref[...], preferred_element_type=jnp.float32)
    h = jnp.maximum(h + b[1:2, :h.shape[-1]], 0.0)

    logits = jnp.dot(h.astype(cdt), w3_ref[...],
                     preferred_element_type=jnp.float32)
    # Row 2 of the packed bias carries -1e30 in padded action columns, so the
    # padded lanes can never win the argmax below.
    scores = logits + b[2:3, :logits.shape[-1]] + gum_ref[...]

    # argmax over the action (lane) axis -> sampled action per row.
    a_pad = scores.shape[-1]
    m = jnp.max(scores, axis=-1, keepdims=True)
    col = lax.broadcasted_iota(jnp.int32, scores.shape, 1)
    idx = jnp.min(jnp.where(scores >= m, col, a_pad), axis=-1, keepdims=True)
    # TODO(synk): a lane-dense (1, block_b) output store would avoid the narrow
    # masked vst, but it needs a sublane->lane relayout that is the only
    # lowering risk in this kernel; the column store costs ~nothing here.
    act_ref[...] = idx.astype(jnp.int32)


def actor_forward(obs, params, sample_key, *,
                  compute_dtype=jnp.bfloat16, max_block_rows=512):
    """obs: (B, obs_dim) f32; params: (w1,b1,w2,b2,w3,b3) with W as (in, out).

    Returns sampled actions of shape (B,) int32 (== Actor.forward)."""
    w1, b1, w2, b2, w3, b3 = params
    B, obs_dim = obs.shape
    hidden = w1.shape[1]
    act_dim = w3.shape[1]

    LANE, SUB = 128, 8
    rup = lambda x, m: ((x + m - 1) // m) * m
    obs_p = rup(obs_dim, LANE)
    hid_p = rup(hidden, LANE)
    act_p = rup(act_dim, LANE)

    # Batch tiling: big sublane-aligned blocks so obs/gumbel streams pipeline.
    block_b = min(max_block_rows, rup(B, SUB))
    B_p = rup(B, block_b)
    num_blocks = B_p // block_b

    cdt = compute_dtype
    obs_pad = jnp.zeros((B_p, obs_p), cdt).at[:B, :obs_dim].set(obs.astype(cdt))
    w1_p = jnp.zeros((obs_p, hid_p), cdt).at[:obs_dim, :hidden].set(w1.astype(cdt))
    w2_p = jnp.zeros((hid_p, hid_p), cdt).at[:hidden, :hidden].set(w2.astype(cdt))
    w3_p = jnp.zeros((hid_p, act_p), cdt).at[:hidden, :act_dim].set(w3.astype(cdt))

    # Pack the three biases into one resident f32 array; padded action columns
    # get -1e30 so the Gumbel-max argmax never selects them.
    width_b = max(hid_p, act_p)
    b_pack = jnp.zeros((3, width_b), jnp.float32)
    b_pack = b_pack.at[0, :hidden].set(b1.astype(jnp.float32))
    b_pack = b_pack.at[1, :hidden].set(b2.astype(jnp.float32))
    b_pack = b_pack.at[2, act_dim:act_p].set(-1e30)
    b_pack = b_pack.at[2, :act_dim].set(b3.astype(jnp.float32))

    # i.i.d. Gumbel(0,1) noise (host-side): Gumbel-max == Categorical sampling.
    gumbel = jax.random.gumbel(sample_key, (B_p, act_p), jnp.float32)

    out = pl.pallas_call(
        actor_kernel,
        out_shape=jax.ShapeDtypeStruct((B_p, 1), jnp.int32),
        grid=(num_blocks,),
        in_specs=[
            pl.BlockSpec((block_b, obs_p), lambda i: (i, 0)),   # streamed
            pl.BlockSpec((block_b, act_p), lambda i: (i, 0)),   # streamed
            pl.BlockSpec((obs_p, hid_p), lambda i: (0, 0)),     # resident
            pl.BlockSpec((hid_p, hid_p), lambda i: (0, 0)),     # resident
            pl.BlockSpec((hid_p, act_p), lambda i: (0, 0)),     # resident
            pl.BlockSpec((3, width_b), lambda i: (0, 0)),       # resident
        ],
        out_specs=pl.BlockSpec((block_b, 1), lambda i: (i, 0)),
        compiler_params=pltpu.CompilerParams(
            dimension_semantics=("parallel",),       # megacore batch split
            vmem_limit_bytes=32 * 1024 * 1024,       # well under v7x 64 MiB
        ),
    )(obs_pad, gumbel, w1_p, w2_p, w3_p, b_pack)

    return out[:B, 0]


def init_actor_params(key, obs_dim, act_dim, hidden_size=64):
    """Deterministic init mimicking nn.Linear's U(-1/sqrt(fan_in), ...)."""
    def linear(k, fan_in, fan_out):
        kw, kb = jax.random.split(k)
        bound = 1.0 / jnp.sqrt(fan_in)
        w = jax.random.uniform(kw, (fan_in, fan_out), jnp.float32, -bound, bound)
        b = jax.random.uniform(kb, (fan_out,), jnp.float32, -bound, bound)
        return w, b

    k1, k2, k3 = jax.random.split(key, 3)
    w1, b1 = linear(k1, obs_dim, hidden_size)
    w2, b2 = linear(k2, hidden_size, hidden_size)
    w3, b3 = linear(k3, hidden_size, act_dim)
    return (w1, b1, w2, b2, w3, b3)


if __name__ == "__main__":
    obs_dim, act_dim, hidden_size = 16, 8, 64
    batch = 8

    key = jax.random.PRNGKey(0)
    k_params, k_obs, k_sample = jax.random.split(key, 3)
    params = init_actor_params(k_params, obs_dim, act_dim, hidden_size)
    obs = jax.random.normal(k_obs, (batch, obs_dim), jnp.float32)

    actions = actor_forward(obs, params, k_sample)
    actions = jax.block_until_ready(actions)

    assert actions.shape == (batch,)
    assert actions.dtype == jnp.int32
    assert bool(jnp.all((actions >= 0) & (actions < act_dim)))
    print("KERNEL_OK")
</pallas_src>

<mosaic_0001>
module attributes {stable_mosaic.version = 11 : i64} {
  func.func @actor_kernel(%arg0: i32, %arg1: memref<8x128xbf16, #tpu.memory_space<vmem>>, %arg2: memref<8x128xf32, #tpu.memory_space<vmem>>, %arg3: memref<128x128xbf16, #tpu.memory_space<vmem>>, %arg4: memref<128x128xbf16, #tpu.memory_space<vmem>>, %arg5: memref<128x128xbf16, #tpu.memory_space<vmem>>, %arg6: memref<3x128xf32, #tpu.memory_space<vmem>>, %arg7: memref<8x1xi32, #tpu.memory_space<vmem>>) attributes {dimension_semantics = [#tpu.dimension_semantics<parallel>], iteration_bounds = array<i64: 1>, scalar_prefetch = 0 : i64, scratch_operands = 0 : i64, tpu.core_type = #tpu.core_type<tc>, window_params = [{transform_indices = @transform_0, window_bounds = array<i64: 8, 128>}, {transform_indices = @transform_1, window_bounds = array<i64: 8, 128>}, {pipeline_mode = #tpu.pipeline_mode<synchronous>, transform_indices = @transform_2, window_bounds = array<i64: 128, 128>}, {pipeline_mode = #tpu.pipeline_mode<synchronous>, transform_indices = @transform_3, window_bounds = array<i64: 128, 128>}, {pipeline_mode = #tpu.pipeline_mode<synchronous>, transform_indices = @transform_4, window_bounds = array<i64: 128, 128>}, {pipeline_mode = #tpu.pipeline_mode<synchronous>, transform_indices = @transform_5, window_bounds = array<i64: 3, 128>}, {transform_indices = @transform_6, window_bounds = array<i64: 8, 1>}]} {
    %c0 = arith.constant 0 : index
    %c0_0 = arith.constant 0 : index
    %0 = vector.load %arg6[%c0, %c0_0] : memref<3x128xf32, #tpu.memory_space<vmem>>, vector<3x128xf32>
    %c0_1 = arith.constant 0 : index
    %c0_2 = arith.constant 0 : index
    %1 = vector.load %arg1[%c0_1, %c0_2] : memref<8x128xbf16, #tpu.memory_space<vmem>>, vector<8x128xbf16>
    %c0_3 = arith.constant 0 : index
    %c0_4 = arith.constant 0 : index
    %2 = vector.load %arg3[%c0_3, %c0_4] : memref<128x128xbf16, #tpu.memory_space<vmem>>, vector<128x128xbf16>
    %cst = arith.constant dense<0.000000e+00> : vector<8x128xf32>
    %3 = tpu.matmul %1, %2, %cst {dimension_numbers = #tpu.dot_dimension_numbers<[1], [0], [0], [1], [0, 0, 1, 1], [], []>} : vector<8x128xbf16>, vector<128x128xbf16>, vector<8x128xf32> -> vector<8x128xf32>
    %4 = vector.extract_strided_slice %0 {offsets = [0, 0], sizes = [1, 128], strides = [1, 1]} : vector<3x128xf32> to vector<1x128xf32>
    %5 = vector.broadcast %4 : vector<1x128xf32> to vector<8x128xf32>
    %6 = arith.addf %3, %5 : vector<8x128xf32>
    %cst_5 = arith.constant 0.000000e+00 : f32
    %7 = vector.broadcast %cst_5 : f32 to vector<8x128xf32>
    %8 = arith.maximumf %6, %7 : vector<8x128xf32>
    %9 = arith.truncf %8 : vector<8x128xf32> to vector<8x128xbf16>
    %c0_6 = arith.constant 0 : index
    %c0_7 = arith.constant 0 : index
    %10 = vector.load %arg4[%c0_6, %c0_7] : memref<128x128xbf16, #tpu.memory_space<vmem>>, vector<128x128xbf16>
    %cst_8 = arith.constant dense<0.000000e+00> : vector<8x128xf32>
    %11 = tpu.matmul %9, %10, %cst_8 {dimension_numbers = #tpu.dot_dimension_numbers<[1], [0], [0], [1], [0, 0, 1, 1], [], []>} : vector<8x128xbf16>, vector<128x128xbf16>, vector<8x128xf32> -> vector<8x128xf32>
    %12 = vector.extract_strided_slice %0 {offsets = [1, 0], sizes = [1, 128], strides = [1, 1]} : vector<3x128xf32> to vector<1x128xf32>
    %13 = vector.broadcast %12 : vector<1x128xf32> to vector<8x128xf32>
    %14 = arith.addf %11, %13 : vector<8x128xf32>
    %cst_9 = arith.constant 0.000000e+00 : f32
    %15 = vector.broadcast %cst_9 : f32 to vector<8x128xf32>
    %16 = arith.maximumf %14, %15 : vector<8x128xf32>
    %17 = arith.truncf %16 : vector<8x128xf32> to vector<8x128xbf16>
    %c0_10 = arith.constant 0 : index
    %c0_11 = arith.constant 0 : index
    %18 = vector.load %arg5[%c0_10, %c0_11] : memref<128x128xbf16, #tpu.memory_space<vmem>>, vector<128x128xbf16>
    %cst_12 = arith.constant dense<0.000000e+00> : vector<8x128xf32>
    %19 = tpu.matmul %17, %18, %cst_12 {dimension_numbers = #tpu.dot_dimension_numbers<[1], [0], [0], [1], [0, 0, 1, 1], [], []>} : vector<8x128xbf16>, vector<128x128xbf16>, vector<8x128xf32> -> vector<8x128xf32>
    %20 = vector.extract_strided_slice %0 {offsets = [2, 0], sizes = [1, 128], strides = [1, 1]} : vector<3x128xf32> to vector<1x128xf32>
    %21 = vector.broadcast %20 : vector<1x128xf32> to vector<8x128xf32>
    %22 = arith.addf %19, %21 : vector<8x128xf32>
    %c0_13 = arith.constant 0 : index
    %c0_14 = arith.constant 0 : index
    %23 = vector.load %arg2[%c0_13, %c0_14] : memref<8x128xf32, #tpu.memory_space<vmem>>, vector<8x128xf32>
    %24 = arith.addf %22, %23 : vector<8x128xf32>
    %cst_15 = arith.constant dense<0xFF800000> : vector<8xf32>
    %25 = vector.multi_reduction <maximumf>, %24, %cst_15 [1] : vector<8x128xf32> to vector<8xf32>
    %26 = vector.shape_cast %25 : vector<8xf32> to vector<8x1xf32>
    %27 = tpu.iota {dimensions = array<i32: 1>} : vector<8x128xi32>
    %28 = vector.broadcast %26 : vector<8x1xf32> to vector<8x128xf32>
    %29 = arith.cmpf oge, %24, %28 : vector<8x128xf32>
    %c128_i32 = arith.constant 128 : i32
    %30 = vector.broadcast %c128_i32 : i32 to vector<8x128xi32>
    %31 = arith.select %29, %27, %30 : vector<8x128xi1>, vector<8x128xi32>
    %cst_16 = arith.constant dense<2147483647> : vector<8xi32>
    %32 = vector.multi_reduction <minsi>, %31, %cst_16 [1] : vector<8x128xi32> to vector<8xi32>
    %33 = vector.shape_cast %32 : vector<8xi32> to vector<8x1xi32>
    %c0_17 = arith.constant 0 : index
    %c0_18 = arith.constant 0 : index
    %34 = vector.load %arg7[%c0_17, %c0_18] : memref<8x1xi32, #tpu.memory_space<vmem>>, vector<8x1xi32>
    tpu.vector_store %arg7[%c0_17, %c0_18], %33 {strides = array<i32>} : memref<8x1xi32, #tpu.memory_space<vmem>>, vector<8x1xi32>,
    return
  }
  func.func @transform_0(%arg0: i32) -> (i32, i32) {
    %c0_i32 = arith.constant 0 : i32
    %c0_i32_0 = arith.constant 0 : i32
    return %arg0, %c0_i32 : i32, i32
  }
  func.func @transform_1(%arg0: i32) -> (i32, i32) {
    %c0_i32 = arith.constant 0 : i32
    %c0_i32_0 = arith.constant 0 : i32
    return %arg0, %c0_i32 : i32, i32
  }
  func.func @transform_2(%arg0: i32) -> (i32, i32) {
    %c0_i32 = arith.constant 0 : i32
    %c0_i32_0 = arith.constant 0 : i32
    %c0_i32_1 = arith.constant 0 : i32
    return %c0_i32, %c0_i32_0 : i32, i32
  }
  func.func @transform_3(%arg0: i32) -> (i32, i32) {
    %c0_i32 = arith.constant 0 : i32
    %c0_i32_0 = arith.constant 0 : i32
    %c0_i32_1 = arith.constant 0 : i32
    return %c0_i32, %c0_i32_0 : i32, i32
  }
  func.func @transform_4(%arg0: i32) -> (i32, i32) {
    %c0_i32 = arith.constant 0 : i32
    %c0_i32_0 = arith.constant 0 : i32
    %c0_i32_1 = arith.constant 0 : i32
    return %c0_i32, %c0_i32_0 : i32, i32
  }
  func.func @transform_5(%arg0: i32) -> (i32, i32) {
    %c0_i32 = arith.constant 0 : i32
    %c0_i32_0 = arith.constant 0 : i32
    %c0_i32_1 = arith.constant 0 : i32
    return %c0_i32, %c0_i32_0 : i32, i32
  }
  func.func @transform_6(%arg0: i32) -> (i32, i32) {
    %c0_i32 = arith.constant 0 : i32
    %c0_i32_0 = arith.constant 0 : i32
    return %arg0, %c0_i32 : i32, i32
  }
}

</mosaic_0001>

<bundles_post_ra>
// kernel: tpu_custom_call.1
= control target key start
LH: loop header
LB: loop body
LE: loop exit
PB: predicated region body
PF: predicated region fallthrough
CT: control target
= control target key end

     0   :  { %11 = vsyncpa [#allocation3], 0  ;;  %s858_s0 = inlined_call_operand.hbm [shape: bf16[8,128], index: 0, kind: input, shape index: {}]   ;;  %s859_s1 = inlined_call_operand.hbm [shape: f32[8,128], index: 1, kind: input, shape index: {}]   ;;  %s860_s2 = inlined_call_operand.hbm [shape: bf16[128,128], index: 2, kind: input, shape index: {}]   ;;  %s861_s3 = inlined_call_operand.hbm [shape: bf16[128,128], index: 3, kind: input, shape index: {}]   ;;  %s862_s4 = inlined_call_operand.hbm [shape: bf16[128,128], index: 4, kind: input, shape index: {}]   ;;  %s863_s5 = inlined_call_operand.vmem [shape: f32[3,128], index: 5, kind: input, shape index: {}]   ;;  %s864_s6 = inlined_call_operand.vmem [shape: s32[8,1], index: 6, kind: output, shape index: {}]  }
   0x1   :  { %12 = vsyncpa [#allocation5], 0 }
   0x2   :  { %13 = vsyncpa [#allocation8], 0  ;;  %s709_s21 = smov [#allocation4]   ;;  %s593_s25 = scalar_lea.hbm %s859_s1, 128 }
   0x3   :  { %s30_s22 = sshll.u32 %s709_s21, 4  ;;  %p594_p0 = scmp.ne.s32.totalorder %s859_s1, %s593_s25  ;;  %s31_s22 = int_to_ptr.vmem [resolvable:$true] %s30_s22 }
   0x4   :  { %p597_p1 = scmp.lt.u32.totalorder %s593_s25, %s859_s1 }
   0x6   :  { %p599_p2 = pnand %p597_p1, %p594_p0 }
   0x8   :  { %602 = shalt.err (!%p599_p2)
}
   0x9   :  { %s603_s30 = scalar_lea.vmem %s31_s22, 128  ;;  %p608_p4 = scmp.lt.s32.totalorder %s31_s22, %s31_s22 }
   0xa   :  { %p604_p3 = scmp.ne.s32.totalorder %s31_s22, %s603_s30  ;;  %p609_p5 = scmp.lt.s32.totalorder %s603_s30, %s603_s30 }
   0xc   :  { %p610_p6 = por %p609_p5, %p608_p4 }
   0xe   :  { %p611_p7 = pnand %p610_p6, %p604_p3 }
  0x10   :  { %614 = shalt.err (!%p611_p7)
}
  0x11   :  { %33 = dma.hbm_to_vmem [thread:$0]  %s859_s1, 128, %s31_s22, [#allocation5]  }
  0x12   :  { %s710_s9 = smov [#allocation7]   ;;  %s711_s11 = smov [#allocation2]  }
  0x13   :  { %s51_s10 = sshll.u32 %s710_s9, 4  ;;  %s20_s12 = sshll.u32 %s711_s11, 4  ;;  %s52_s10 = int_to_ptr.vmem [resolvable:$true] %s51_s10  ;;  %s21_s12 = int_to_ptr.vmem [resolvable:$true] %s20_s12 }
  0x14   :  { %s615_s15 = scalar_lea.hbm %s861_s3, 1024 }
  0x15   :  { %p616_p8 = scmp.ne.s32.totalorder %s861_s3, %s615_s15  ;;  %p619_p9 = scmp.lt.u32.totalorder %s615_s15, %s861_s3 }
  0x17   :  { %p621_p10 = pnand %p619_p9, %p616_p8 }
  0x19   :  { %624 = shalt.err (!%p621_p10)
}
  0x1a   :  { %s625_s1 = scalar_lea.vmem %s52_s10, 1024  ;;  %p630_p12 = scmp.lt.s32.totalorder %s52_s10, %s52_s10 }
  0x1b   :  { %p626_p11 = scmp.ne.s32.totalorder %s52_s10, %s625_s1  ;;  %p631_p13 = scmp.lt.s32.totalorder %s625_s1, %s625_s1 }
  0x1d   :  { %p632_p0 = por %p631_p13, %p630_p12 }
  0x1f   :  { %p633_p1 = pnand %p632_p0, %p626_p11 }
  0x21   :  { %636 = shalt.err (!%p633_p1)
}
  0x22   :  { %s712_s20 = smov 64   ;;  %s713_s21 = smov 4  }
  0x23   :  { %57 = dma.hbm_to_vmem [thread:$0]  %s861_s3, 1024, %s52_s10, [#allocation8], %s712_s20, %s712_s20, %s713_s21  }
  0x24   :  { %s637_s26 = scalar_lea.hbm %s858_s0, 64 }
  0x25   :  { %p638_p2 = scmp.ne.s32.totalorder %s858_s0, %s637_s26  ;;  %p641_p3 = scmp.lt.u32.totalorder %s637_s26, %s858_s0 }
  0x27   :  { %p643_p4 = pnand %p641_p3, %p638_p2 }
  0x29   :  { %646 = shalt.err (!%p643_p4)
}
  0x2a   :  { %s647_s7 = scalar_lea.vmem %s21_s12, 64  ;;  %p652_p6 = scmp.lt.s32.totalorder %s21_s12, %s21_s12 }
  0x2b   :  { %p648_p5 = scmp.ne.s32.totalorder %s21_s12, %s647_s7  ;;  %p653_p7 = scmp.lt.s32.totalorder %s647_s7, %s647_s7 }
  0x2d   :  { %p654_p8 = por %p653_p7, %p652_p6 }
  0x2f   :  { %p655_p9 = pnand %p654_p8, %p648_p5 }
  0x31   :  { %658 = shalt.err (!%p655_p9)
}
  0x32   :  { %23 = dma.hbm_to_vmem [thread:$0]  %s858_s0, 64, %s21_s12, [#allocation3]  }
  0x33   :  { %s714_s9 = smov [#allocation6]   ;;  %s715_s11 = smov [#allocation9]  }
  0x34   :  { %s39_s10 = sshll.u32 %s714_s9, 4  ;;  %s63_s13 = sshll.u32 %s715_s11, 4  ;;  %s40_s10 = int_to_ptr.vmem [resolvable:$true] %s39_s10  ;;  %s64_s13 = int_to_ptr.vmem [resolvable:$true] %s63_s13 }
  0x35   :  { %s659_s16 = scalar_lea.hbm %s860_s2, 1024 }
  0x36   :  { %p660_p10 = scmp.ne.s32.totalorder %s860_s2, %s659_s16  ;;  %p663_p11 = scmp.lt.u32.totalorder %s659_s16, %s860_s2 }
  0x38   :  { %p665_p12 = pnand %p663_p11, %p660_p10 }
  0x3a   :  { %668 = shalt.err (!%p665_p12)
}
  0x3b   :  { %s669_s0 = scalar_lea.vmem %s40_s10, 1024  ;;  %p674_p0 = scmp.lt.s32.totalorder %s40_s10, %s40_s10 }
  0x3c   :  { %p670_p13 = scmp.ne.s32.totalorder %s40_s10, %s669_s0  ;;  %p675_p1 = scmp.lt.s32.totalorder %s669_s0, %s669_s0 }
  0x3e   :  { %p676_p2 = por %p675_p1, %p674_p0 }
  0x40   :  { %p677_p3 = pnand %p676_p2, %p670_p13 }
  0x42   :  { %680 = shalt.err (!%p677_p3)
}
  0x43   :  { %45 = dma.hbm_to_vmem [thread:$0]  %s860_s2, 1024, %s40_s10, [#allocation5], %s712_s20, %s712_s20, %s713_s21  }
  0x44   :  { %s681_s25 = scalar_lea.hbm %s862_s4, 1024 }
  0x45   :  { %p682_p4 = scmp.ne.s32.totalorder %s862_s4, %s681_s25  ;;  %p685_p5 = scmp.lt.u32.totalorder %s681_s25, %s862_s4 }
  0x47   :  { %p687_p6 = pnand %p685_p5, %p682_p4 }
  0x49   :  { %690 = shalt.err (!%p687_p6)
}
  0x4a   :  { %s691_s30 = scalar_lea.vmem %s64_s13, 1024  ;;  %p696_p8 = scmp.lt.s32.totalorder %s64_s13, %s64_s13 }
  0x4b   :  { %p692_p7 = scmp.ne.s32.totalorder %s64_s13, %s691_s30  ;;  %p697_p9 = scmp.lt.s32.totalorder %s691_s30, %s691_s30 }
  0x4d   :  { %p698_p10 = por %p697_p9, %p696_p8 }
  0x4f   :  { %p699_p11 = pnand %p698_p10, %p692_p7 }
  0x51   :  { %702 = shalt.err (!%p699_p11)
}
  0x52   :  { %69 = dma.hbm_to_vmem [thread:$0]  %s862_s4, 1024, %s64_s13, [#allocation8], %s712_s20, %s712_s20, %s713_s21  }
  0x53   :  { %703 = dma.done.wait [#allocation3], 64  }
  0x54   :  { %704 = vsyncadd [#allocation3], 4294967232 }
  0x55   :  { %705 = dma.done.wait [#allocation5], 1152  }
  0x56   :  { %706 = vsyncadd [#allocation5], 4294966144 }
  0x57   :  { %707 = dma.done.wait [#allocation8], 2048  }
  0x58   :  { %708 = vsyncadd [#allocation8], 4294965248  ;;  %v716_v0 = vmov 0.0   ;;  %vm717_vm0 = vmmov 0   ;;  %v569_v1 = vld [vmem:[#allocation6] sm:$0xff]   ;;  %v570_v2 = vld [vmem:[#allocation6 + $0x8] sm:$0xff]   ;;  %v106_v24 = vlaneseq }
  0x59   :  { %500 = vmatprep.subr.bf16.mxu0 %v716_v0  ;;  %516 = vmatprep.mubr.msk.bf16.mxu0 %vm717_vm0, %v716_v0  ;;  %v571_v3 = vld [vmem:[#allocation6 + $0x10] sm:$0xff]   ;;  %v577_v4 = vld [vmem:[#allocation7] sm:$0xff]   ;;  %v572_v5 = vld [vmem:[#allocation6 + $0x18] sm:$0xff]   ;;  %vm440_vm3 = vcmask 7168  }
  0x5a   :  { %520 = vmatprep.subr.bf16.mxu1 %v716_v0  ;;  %536 = vmatprep.mubr.msk.bf16.mxu1 %vm717_vm0, %v716_v0  ;;  %v578_v6 = vld [vmem:[#allocation7 + $0x8] sm:$0xff]   ;;  %v573_v7 = vld [vmem:[#allocation6 + $0x20] sm:$0xff]   ;;  %v579_v8 = vld [vmem:[#allocation7 + $0x10] sm:$0xff]   ;;  %v107_v25 = vshrl.u32 %v106_v24, 7  ;;  %v423_v56 = vand.u32 127, %v106_v24 }
  0x5b   :  { %501 = vmatpush3.bf16.msra.mxu0 %v569_v1  ;;  %521 = vmatpush3.bf16.msra.mxu1 %v577_v4  ;;  %v574_v9 = vld [vmem:[#allocation6 + $0x28] sm:$0xff]   ;;  %v580_v10 = vld [vmem:[#allocation7 + $0x18] sm:$0xff]   ;;  %v575_v11 = vld [vmem:[#allocation6 + $0x30] sm:$0xff]  }
  0x5c   :  { %502 = vmatprep.subr.bf16.mxu0 %v716_v0  ;;  %522 = vmatprep.subr.bf16.mxu1 %v716_v0  ;;  %v581_v12 = vld [vmem:[#allocation7 + $0x20] sm:$0xff]   ;;  %v576_v13 = vld [vmem:[#allocation6 + $0x38] sm:$0xff]   ;;  %v582_v14 = vld [vmem:[#allocation7 + $0x28] sm:$0xff]   ;;  %v108_v26 = vsub.s32 0, %v107_v25  ;;  %v218_v38 = vsub.s32 1, %v107_v25  ;;  %v328_v47 = vsub.s32 2, %v107_v25 }
  0x5d   :  { %v89_v15 = vld [vmem:[#allocation2] sm:$0xf]  ;;  %v584_v17 = vld [vmem:[#allocation7 + $0x38] sm:$0xff]   ;;  %v585_v18 = vld [vmem:[#allocation9] sm:$0xff]  }
  0x5e   :  { %v583_v16 = vld [vmem:[#allocation7 + $0x30] sm:$0xff]   ;;  %v586_v19 = vld [vmem:[#allocation9 + $0x8] sm:$0xff]   ;;  %v588_v21 = vld [vmem:[#allocation9 + $0x18] sm:$0xff]  }
  0x5f   :  { %503 = vmatpush3.bf16.msra.mxu0 %v570_v2  ;;  %523 = vmatpush3.bf16.msra.mxu1 %v578_v6  ;;  %v587_v20 = vld [vmem:[#allocation9 + $0x10] sm:$0xff]   ;;  %v589_v22 = vld [vmem:[#allocation9 + $0x20] sm:$0xff]   ;;  %v590_v23 = vld [vmem:[#allocation9 + $0x28] sm:$0xff]  }
  0x60   :  { %504 = vmatprep.subr.bf16.mxu0 %v716_v0  ;;  %524 = vmatprep.subr.bf16.mxu1 %v716_v0  ;;  %v88_v27 = vld [vmem:[%s863_s5] sm:$0x7]  ;;  %v592_v37 = vld [vmem:[#allocation9 + $0x38] sm:$0xff]  }
  0x61   :  { %v109_v28 = vrot.slane %v88_v27, %v108_v26  ;;  %v591_v36 = vld [vmem:[#allocation9 + $0x30] sm:$0xff]   ;;  %v219_v39 = vrot.slane %v88_v27, %v218_v38  ;;  %v329_v48 = vrot.slane %v88_v27, %v328_v47  ;;  %v418_v50 = vld [vmem:[#allocation4] sm:$0xff] }
  0x63   :  { %505 = vmatpush3.bf16.msra.mxu0 %v571_v3  ;;  %525 = vmatpush3.bf16.msra.mxu1 %v579_v8 }
  0x64   :  { %506 = vmatprep.subr.bf16.mxu0 %v716_v0  ;;  %526 = vmatprep.subr.bf16.mxu1 %v716_v0 }
  0x67   :  { %507 = vmatpush3.bf16.msra.mxu0 %v572_v5  ;;  %527 = vmatpush3.bf16.msra.mxu1 %v580_v10 }
  0x68   :  { %508 = vmatprep.subr.bf16.mxu0 %v716_v0  ;;  %528 = vmatprep.subr.bf16.mxu1 %v716_v0 }
  0x6b   :  { %509 = vmatpush3.bf16.msra.mxu0 %v573_v7  ;;  %529 = vmatpush3.bf16.msra.mxu1 %v581_v12 }
  0x6c   :  { %510 = vmatprep.subr.bf16.mxu0 %v716_v0  ;;  %530 = vmatprep.subr.bf16.mxu1 %v716_v0 }
  0x6f   :  { %511 = vmatpush3.bf16.msra.mxu0 %v574_v9  ;;  %531 = vmatpush3.bf16.msra.mxu1 %v582_v14 }
  0x70   :  { %512 = vmatprep.subr.bf16.mxu0 %v716_v0  ;;  %532 = vmatprep.subr.bf16.mxu1 %v716_v0 }
  0x73   :  { %513 = vmatpush3.bf16.msra.mxu0 %v575_v11  ;;  %533 = vmatpush3.bf16.msra.mxu1 %v583_v16 }
  0x74   :  { %514 = vmatprep.subr.bf16.mxu0 %v716_v0  ;;  %534 = vmatprep.subr.bf16.mxu1 %v716_v0 }
  0x77   :  { %515 = vmatpush3.bf16.msra.mxu0 %v576_v13  ;;  %535 = vmatpush3.bf16.msra.mxu1 %v584_v17 }
  0x78   :  { %540 = vmatprep.subr.bf16.mxu0 %v716_v0 }
  0x7a   :  { %517 = vmatmul.mubr.bf16.vlgmr.msra.gmra.mrb[0].mxu0 %v89_v15 }
  0x7b   :  { %556 = vmatprep.mubr.msk.bf16.mxu0 %vm717_vm0, %v716_v0  ;;  %541 = vmatpush3.bf16.msra.mxu0 %v585_v18 }
  0x7c   :  { %542 = vmatprep.subr.bf16.mxu0 %v716_v0 }
  0x7f   :  { %543 = vmatpush3.bf16.msra.mxu0 %v586_v19 }
  0x80   :  { %544 = vmatprep.subr.bf16.mxu0 %v716_v0 }
  0x83   :  { %545 = vmatpush3.bf16.msra.mxu0 %v587_v20 }
  0x84   :  { %546 = vmatprep.subr.bf16.mxu0 %v716_v0 }
  0x87   :  { %547 = vmatpush3.bf16.msra.mxu0 %v588_v21 }
  0x88   :  { %548 = vmatprep.subr.bf16.mxu0 %v716_v0 }
  0x8b   :  { %549 = vmatpush3.bf16.msra.mxu0 %v589_v22 }
  0x8c   :  { %550 = vmatprep.subr.bf16.mxu0 %v716_v0 }
  0x8f   :  { %551 = vmatpush3.bf16.msra.mxu0 %v590_v23 }
  0x90   :  { %552 = vmatprep.subr.bf16.mxu0 %v716_v0 }
  0x93   :  { %553 = vmatpush3.bf16.msra.mxu0 %v591_v36 }
  0x94   :  { %554 = vmatprep.subr.bf16.mxu0 %v716_v0 }
  0x97   :  { %555 = vmatpush3.bf16.msra.mxu0 %v592_v37 }
 0x14d   :  { %v192_v29 = vpop.f32.mrb[0].mxu0 }
 0x14e   :  { %v193_v30 = vadd.f32 %v192_v29, %v109_v28  ;;  %v518_v31 = vpop.f32.mrb[1].mxu0 }
 0x14f   :  { %v195_v32 = vpop.f32.mrb[2].mxu0 }
 0x150   :  { %v198_v33 = vmax.f32 %v193_v30, 0.0  ;;  %v519_v34 = vpop.f32.mrb[3].mxu0 }
 0x152   :  { %v199_v35 = vpack.c.bf16 %v198_v33, %v198_v33 }
 0x154   :  { %537 = vmatmul.mubr.bf16.vlgmr.msra.gmra.mrb[0].mxu1 %v199_v35 }
 0x227   :  { %v302_v40 = vpop.f32.mrb[0].mxu1 }
 0x228   :  { %v303_v41 = vadd.f32 %v302_v40, %v219_v39  ;;  %v538_v42 = vpop.f32.mrb[1].mxu1 }
 0x229   :  { %v305_v43 = vpop.f32.mrb[2].mxu1 }
 0x22a   :  { %v308_v44 = vmax.f32 %v303_v41, 0.0  ;;  %v539_v45 = vpop.f32.mrb[3].mxu1 }
 0x22c   :  { %v309_v46 = vpack.c.bf16 %v308_v44, %v308_v44 }
 0x22e   :  { %557 = vmatmul.mubr.bf16.vlgmr.msra.gmra.mrb[4].mxu0 %v309_v46 }
 0x301   :  { %v412_v49 = vpop.f32.mrb[4].mxu0 }
 0x302   :  { %v413_v51 = vadd.f32 %v412_v49, %v329_v48  ;;  %v558_v52 = vpop.f32.mrb[5].mxu0 }
 0x303   :  { %v415_v53 = vpop.f32.mrb[6].mxu0 }
 0x304   :  { %v559_v54 = vpop.f32.mrb[7].mxu0  ;;  %v419_v55 = vadd.f32 %v418_v50, %v413_v51 }
 0x306   :  { %420 = vmax.xlane.f32.xlu0 %v419_v55 }
 0x393   :  { %v421_v57 = vpop.xlane.xlu0 %420 }
 0x394   :  { %vm424_vm1 = vcmp.ge.f32.partialorder %v419_v55, %v421_v57 }
 0x395   :  { %v425_v58 = vsel %vm424_vm1, %v423_v56, 128 }
 0x396   :  { %v427_v59 = vshra.s32 %v425_v58, 16  ;;  %v426_v61 = vand.u32 65535, %v425_v58 }
 0x398   :  { %v429_v60 = vcvt.s32.f32 %v427_v59  ;;  %v428_v63 = vcvt.s32.f32 %v426_v61 }
 0x39a   :  { %430 = vmin.xlane.f32.xlu0 %v429_v60 }
 0x427   :  { %v431_v62 = vpop.xlane.xlu0 %430 }
 0x428   :  { %vm432_vm2 = vcmp.eq.f32.partialorder %v429_v60, %v431_v62  ;;  %v437_v1 = vcvt.f32.s32 %v431_v62 }
 0x429   :  { %v433_v0 = vsel %vm432_vm2, %v428_v63, inf }
 0x42a   :  { %434 = vmin.xlane.f32.xlu1 %v433_v0  ;;  %v438_v3 = vshll.u32 %v437_v1, 16 }
 0x4b7   :  { %v435_v2 = vpop.xlane.xlu1 %434 }
 0x4b8   :  { %v436_v4 = vcvt.f32.s32 %v435_v2 }
 0x4ba   :  { %v439_v5 = vadd.s32 %v438_v3, %v436_v4 }
 0x4bc   :  { %441 = vst.msk [vmem:[%s864_s6] sm:$0xff] %vm440_vm3, %v439_v5 }
 0x4bd   :  { %446 = vsyncpa [#allocation3], 1 }
 0x4be   :  { %447 = vsyncpa [#allocation5], 1 }
 0x4bf   :  { %448 = vsyncpa [#allocation8], 1 }

</bundles_post_ra>
